<compile_context>
chip_gen: v5e
topology: v5e:2x2
jax: 0.10.0
libtpu: 0.0.40
codegen_flags: <defaults>
</compile_context>

<pallas_src>
import functools

import jax
import jax.numpy as jnp
from jax import lax
from jax.experimental import pallas as pl
from jax.experimental.pallas import tpu as pltpu


def _round_up(x, m):
    return ((x + m - 1) // m) * m


def _simvq_kernel(z_ref, emb_ref, pw_ref, pb_ref,          # inputs
                  zq_ref, idx_ref, loss_ref,               # outputs
                  cb_ref, cbsq_ref, acc_ref,               # scratch
                  *, beta, n_e, e_dim, n_rows, n_rows_pad, tile_n):
    """Per-tile body.

    z_ref   : (TILE_N, D_pad)   f32  row tile of flattened z (zero-padded)
    emb_ref : (nE_pad, D_pad)   f32  frozen embedding weight (zero-padded)
    pw_ref  : (D_pad, D_pad)    f32  embedding_proj.weight (untransposed)
    pb_ref  : (1, D_pad)        f32  embedding_proj.bias
    zq_ref  : (TILE_N, D_pad)   f32  straight-through quantized output
    idx_ref : (1, 1, TILE_N)    i32  lane-major argmin indices for this tile
    loss_ref: (1,)              f32  commitment loss (SMEM, written on last tile)
    cb_ref  : (nE_pad, D_pad)   f32  VMEM scratch: projected codebook
    cbsq_ref: (1, nE_pad)       f32  VMEM scratch: |cb|^2 row (BIG on pad lanes)
    acc_ref : (1,)              f32  SMEM scratch: running sum of (z_q - z)^2
    """
    i = pl.program_id(0)
    n_tiles = pl.num_programs(0)
    ne_pad = cb_ref.shape[0]

    # ---- one-time init (projection hoisted out of the per-tile loop) -------
    @pl.when(i == 0)
    def _init():
        # nn.Linear: cb = emb @ W^T + b  (contract last dims -> no transpose op)
        cb = lax.dot_general(emb_ref[...], pw_ref[...],
                             (((1,), (1,)), ((), ())),
                             preferred_element_type=jnp.float32) + pb_ref[...]
        # zero out padded codebook rows (they picked up the bias)
        row_ids = lax.broadcasted_iota(jnp.int32, cb.shape, 0)
        cb = jnp.where(row_ids < n_e, cb, 0.0)
        cb_ref[...] = cb
        # |cb|^2 as a lane-major row; padded lanes -> huge so argmin never
        # selects them.
        cb_sq = jnp.sum(cb * cb, axis=1)[None, :]          # (1, nE_pad)
        col_ids = lax.broadcasted_iota(jnp.int32, cb_sq.shape, 1)
        cbsq_ref[...] = jnp.where(col_ids < n_e, cb_sq, jnp.float32(1e30))
        acc_ref[0] = jnp.float32(0.0)

    # ---- per-tile work ------------------------------------------------------
    z = z_ref[...]                                          # (T, D_pad)
    cb = cb_ref[...]                                        # (nE_pad, D_pad)

    # distances up to the per-row constant |z|^2 (irrelevant for argmin)
    # TODO(synk): optional bf16 cast of z/cb here for v6e/v7x MXU peak rate
    # (kept f32 to match torch argmin tie behavior exactly).
    cross = lax.dot_general(z, cb, (((1,), (1,)), ((), ())),
                            preferred_element_type=jnp.float32)  # (T, nE_pad)
    d = cbsq_ref[...] - 2.0 * cross

    # first-occurrence argmin (matches torch.argmin) via min + iota trick
    lane_ids = lax.broadcasted_iota(jnp.int32, d.shape, 1)
    d_min = jnp.min(d, axis=1, keepdims=True)
    idx = jnp.min(jnp.where(d <= d_min, lane_ids, ne_pad),
                  axis=1, keepdims=True)                    # (T, 1) int32

    # gather codebook rows with a one-hot MXU matmul
    one_hot = (lane_ids == idx).astype(jnp.float32)         # (T, nE_pad)
    z_q = jnp.dot(one_hot, cb, preferred_element_type=jnp.float32)  # (T, D_pad)

    diff = z_q - z
    zq_ref[...] = z + diff                                  # straight-through

    # commitment-loss partial sum (mask rows that are pure padding)
    sq = diff * diff
    if n_rows_pad != n_rows:                                # trace-time branch
        row = lax.broadcasted_iota(jnp.int32, (tile_n, 1), 0) + i * tile_n
        sq = sq * (row < n_rows).astype(jnp.float32)
    acc_ref[0] += jnp.sum(sq)

    # lane-dense index output: idx_row[0, r] = sum_j j * one_hot[r, j]
    jvec = lax.broadcasted_iota(jnp.int32, (1, ne_pad), 1).astype(jnp.float32)
    idx_row = lax.dot_general(jvec, one_hot, (((1,), (1,)), ((), ())),
                              preferred_element_type=jnp.float32)  # (1, T)
    idx_ref[0] = (idx_row + 0.5).astype(jnp.int32)          # round -> exact

    # ---- finalize loss on the last tile ------------------------------------
    @pl.when(i == n_tiles - 1)
    def _finalize():
        # legacy=True: mean((zq-z)^2) + beta*mean((zq-z)^2) == (1+beta)*MSE
        loss_ref[0] = acc_ref[0] * jnp.float32((1.0 + beta) / (n_rows * e_dim))


def simvq_forward(z_nchw, emb_w, proj_w, proj_b, *, beta=0.25, tile_n=512):
    """SimVQ.forward.  z_nchw: (B, e_dim, H, W) float32.

    Returns (z_q (B, e_dim, H, W), indices (1, B, H) int32, commit_loss scalar).
    """
    B, C, H, W = z_nchw.shape
    n_e, e_dim = emb_w.shape
    assert C == e_dim
    # sane_index_shape reshapes B*H*W indices into (1, B, H) -> requires W == 1
    # exactly as the original PyTorch reshape does.
    assert W == 1, "sane_index_shape=(1,B,H) assumes W == 1 (as in the module)"
    N = B * H * W

    # pad to MXU/lane-native sizes
    d_pad = max(128, _round_up(e_dim, 128))
    ne_pad = max(128, _round_up(n_e, 128))
    tile = min(int(tile_n), _round_up(N, 8))
    tile = _round_up(tile, 8)
    n_pad = _round_up(N, tile)
    grid = (n_pad // tile,)

    # glue: b c h w -> b h w c -> (N, e_dim), zero-pad rows/lanes
    z_flat = jnp.transpose(z_nchw, (0, 2, 3, 1)).reshape(N, e_dim)
    z_flat = z_flat.astype(jnp.float32)
    z_p = jnp.pad(z_flat, ((0, n_pad - N), (0, d_pad - e_dim)))
    emb_p = jnp.pad(emb_w.astype(jnp.float32),
                    ((0, ne_pad - n_e), (0, d_pad - e_dim)))
    pw_p = jnp.pad(proj_w.astype(jnp.float32),
                   ((0, d_pad - e_dim), (0, d_pad - e_dim)))
    pb_p = jnp.pad(proj_b.astype(jnp.float32),
                   (0, d_pad - e_dim)).reshape(1, d_pad)

    kernel = functools.partial(
        _simvq_kernel, beta=float(beta), n_e=n_e, e_dim=e_dim,
        n_rows=N, n_rows_pad=n_pad, tile_n=tile)

    # NOTE: the row axis is a reduction axis for the loss accumulator and the
    # projected-codebook scratch is written at program_id==0, so it is marked
    # "arbitrary".
    # TODO(synk): per-core partial sums + precomputed cb would allow "parallel"
    # for v7x megacore; TODO(synk): online argmin over tiled n_e for n_e >~ 4K.
    zq_p, idx_p, loss = pl.pallas_call(
        kernel,
        grid=grid,
        in_specs=[
            pl.BlockSpec((tile, d_pad), lambda i: (i, 0)),      # z tile
            pl.BlockSpec((ne_pad, d_pad), lambda i: (0, 0)),    # emb (resident)
            pl.BlockSpec((d_pad, d_pad), lambda i: (0, 0)),     # proj_w
            pl.BlockSpec((1, d_pad), lambda i: (0, 0)),         # proj_b
        ],
        out_specs=(
            pl.BlockSpec((tile, d_pad), lambda i: (i, 0)),      # z_q (lane-dense)
            pl.BlockSpec((1, 1, tile), lambda i: (i, 0, 0)),    # idx (lane-major)
            pl.BlockSpec(memory_space=pltpu.MemorySpace.SMEM),  # loss scalar
        ),
        out_shape=(
            jax.ShapeDtypeStruct((n_pad, d_pad), jnp.float32),
            jax.ShapeDtypeStruct((grid[0], 1, tile), jnp.int32),
            jax.ShapeDtypeStruct((1,), jnp.float32),
        ),
        scratch_shapes=[
            pltpu.VMEM((ne_pad, d_pad), jnp.float32),   # projected codebook
            pltpu.VMEM((1, ne_pad), jnp.float32),       # |cb|^2 row
            pltpu.SMEM((1,), jnp.float32),              # loss partial sum
        ],
        compiler_params=pltpu.CompilerParams(
            dimension_semantics=("arbitrary",),
            vmem_limit_bytes=64 * 1024 * 1024,
        ),
    )(z_p, emb_p, pw_p, pb_p)

    # glue: slice padding off, (N, e_dim) -> b h w c -> b c h w
    zq = zq_p[:N, :e_dim]
    z_q = jnp.transpose(zq.reshape(B, H, W, e_dim), (0, 3, 1, 2))
    idx = idx_p.reshape(-1)[:N]
    # sane_index_shape: reshape(1, z_q.shape[0], z_q.shape[2]) == (1, B, H)
    # TODO(synk): remap_to_used path not implemented (remap=None in __init__).
    min_encoding_indices = idx.reshape(1, z_q.shape[0], z_q.shape[2])
    return z_q, min_encoding_indices, loss[0]


def _simvq_reference(z_nchw, emb_w, proj_w, proj_b, *, beta=0.25):
    """Pure-JAX reference mirroring the PyTorch forward."""
    B, C, H, W = z_nchw.shape
    zb = jnp.transpose(z_nchw, (0, 2, 3, 1)).reshape(-1, C)
    cb = emb_w @ proj_w.T + proj_b
    d = (jnp.sum(zb ** 2, axis=1, keepdims=True)
         + jnp.sum(cb ** 2, axis=1)
         - 2.0 * zb @ cb.T)
    idx = jnp.argmin(d, axis=1).astype(jnp.int32)
    zq = cb[idx]
    loss = jnp.mean((zq - zb) ** 2) + beta * jnp.mean((zq - zb) ** 2)
    zq_out = (zb + (zq - zb)).reshape(B, H, W, C).transpose(0, 3, 1, 2)
    return zq_out, idx.reshape(1, B, H), loss


def _run_case(key, B, e_dim, H, W, n_e, beta, tile_n):
    k_z, k_emb, k_w, k_b = jax.random.split(key, 4)
    z = jax.random.normal(k_z, (B, e_dim, H, W), dtype=jnp.float32)
    emb_w = jax.random.normal(k_emb, (n_e, e_dim), jnp.float32) * (e_dim ** -0.5)
    bound = 1.0 / (e_dim ** 0.5)
    proj_w = jax.random.uniform(k_w, (e_dim, e_dim), jnp.float32, -bound, bound)
    proj_b = jax.random.uniform(k_b, (e_dim,), jnp.float32, -bound, bound)

    z_q, idx, commit_loss = simvq_forward(z, emb_w, proj_w, proj_b,
                                          beta=beta, tile_n=tile_n)
    jax.block_until_ready((z_q, idx, commit_loss))

    zq_ref, idx_ref, loss_ref = _simvq_reference(z, emb_w, proj_w, proj_b,
                                                 beta=beta)
    assert z_q.shape == (B, e_dim, H, W)
    assert idx.shape == (1, B, H)
    assert jnp.allclose(z_q, zq_ref, atol=1e-4, rtol=1e-4)
    assert jnp.array_equal(idx, idx_ref.astype(jnp.int32))
    assert jnp.allclose(commit_loss, loss_ref, atol=1e-5, rtol=1e-5)


if __name__ == "__main__":
    # Small shapes consistent with the module (W=1 because sane_index_shape
    # reshapes B*H*W indices into (1, B, H)).
    beta = 0.25
    root = jax.random.PRNGKey(0)
    k1, k2, k3 = jax.random.split(root, 3)

    # single-tile path
    _run_case(k1, B=2, e_dim=32, H=16, W=1, n_e=64, beta=beta, tile_n=512)
    # multi-tile grid (4 steps): exercises cb scratch reuse + loss accumulation
    _run_case(k2, B=2, e_dim=32, H=16, W=1, n_e=64, beta=beta, tile_n=8)
    # N not a multiple of the tile: exercises row padding + loss masking
    _run_case(k3, B=2, e_dim=32, H=13, W=1, n_e=64, beta=beta, tile_n=8)

    print("KERNEL_OK")
</pallas_src>

<mosaic_0001>
module attributes {stable_mosaic.version = 11 : i64} {
  func.func @_simvq_kernel(%arg0: i32, %arg1: memref<32x128xf32, #tpu.memory_space<vmem>>, %arg2: memref<128x128xf32, #tpu.memory_space<vmem>>, %arg3: memref<128x128xf32, #tpu.memory_space<vmem>>, %arg4: memref<1x128xf32, #tpu.memory_space<vmem>>, %arg5: memref<32x128xf32, #tpu.memory_space<vmem>>, %arg6: memref<1x1x32xi32, #tpu.memory_space<vmem>>, %arg7: memref<1xf32, #tpu.memory_space<smem>>, %arg8: memref<128x128xf32, #tpu.memory_space<vmem>>, %arg9: memref<1x128xf32, #tpu.memory_space<vmem>>, %arg10: memref<1xf32, #tpu.memory_space<smem>>) attributes {dimension_semantics = [#tpu.dimension_semantics<arbitrary>], iteration_bounds = array<i64: 1>, scalar_prefetch = 0 : i64, scratch_operands = 3 : i64, tpu.core_type = #tpu.core_type<tc>, window_params = [{transform_indices = @transform_0, window_bounds = array<i64: 32, 128>}, {pipeline_mode = #tpu.pipeline_mode<synchronous>, transform_indices = @transform_1, window_bounds = array<i64: 128, 128>}, {pipeline_mode = #tpu.pipeline_mode<synchronous>, transform_indices = @transform_2, window_bounds = array<i64: 128, 128>}, {pipeline_mode = #tpu.pipeline_mode<synchronous>, transform_indices = @transform_3, window_bounds = array<i64: 1, 128>}, {transform_indices = @transform_4, window_bounds = array<i64: 32, 128>}, {transform_indices = @transform_5, window_bounds = array<i64: 1, 1, 32>}, {transform_indices = @transform_6, window_bounds = array<i64: 1>}]} {
    %c0_i32 = arith.constant 0 : i32
    %0 = arith.cmpi eq, %arg0, %c0_i32 : i32
    %1 = arith.extui %0 : i1 to i32
    %c0_i32_0 = arith.constant 0 : i32
    %2 = arith.cmpi ne, %1, %c0_i32_0 : i32
    scf.if %2 {
      %c0_22 = arith.constant 0 : index
      %c0_23 = arith.constant 0 : index
      %48 = vector.load %arg2[%c0_22, %c0_23] : memref<128x128xf32, #tpu.memory_space<vmem>>, vector<128x128xf32>
      %c0_24 = arith.constant 0 : index
      %c0_25 = arith.constant 0 : index
      %49 = vector.load %arg3[%c0_24, %c0_25] : memref<128x128xf32, #tpu.memory_space<vmem>>, vector<128x128xf32>
      %cst_26 = arith.constant dense<0.000000e+00> : vector<128x128xf32>
      %50 = tpu.matmul %48, %49, %cst_26 {dimension_numbers = #tpu.dot_dimension_numbers<[1], [1], [0], [0], [0, 0, 1, 0], [], []>} : vector<128x128xf32>, vector<128x128xf32>, vector<128x128xf32> -> vector<128x128xf32>
      %c0_27 = arith.constant 0 : index
      %c0_28 = arith.constant 0 : index
      %51 = vector.load %arg4[%c0_27, %c0_28] : memref<1x128xf32, #tpu.memory_space<vmem>>, vector<1x128xf32>
      %52 = vector.broadcast %51 : vector<1x128xf32> to vector<128x128xf32>
      %53 = arith.addf %50, %52 : vector<128x128xf32>
      %54 = tpu.iota {dimensions = array<i32: 0>} : vector<128x128xi32>
      %c64_i32 = arith.constant 64 : i32
      %55 = vector.broadcast %c64_i32 : i32 to vector<128x128xi32>
      %56 = arith.cmpi slt, %54, %55 : vector<128x128xi32>
      %cst_29 = arith.constant 0.000000e+00 : f32
      %57 = vector.broadcast %cst_29 : f32 to vector<128x128xf32>
      %58 = arith.select %56, %53, %57 : vector<128x128xi1>, vector<128x128xf32>
      %c0_30 = arith.constant 0 : index
      %c0_31 = arith.constant 0 : index
      %59 = vector.load %arg8[%c0_30, %c0_31] : memref<128x128xf32, #tpu.memory_space<vmem>>, vector<128x128xf32>
      tpu.vector_store %arg8[%c0_30, %c0_31], %58 {strides = array<i32>} : memref<128x128xf32, #tpu.memory_space<vmem>>, vector<128x128xf32>,
      %60 = arith.mulf %58, %58 : vector<128x128xf32>
      %cst_32 = arith.constant dense<0.000000e+00> : vector<128xf32>
      %61 = vector.multi_reduction <add>, %60, %cst_32 [1] : vector<128x128xf32> to vector<128xf32>
      %62 = vector.shape_cast %61 : vector<128xf32> to vector<1x128xf32>
      %63 = tpu.iota {dimensions = array<i32: 1>} : vector<1x128xi32>
      %c64_i32_33 = arith.constant 64 : i32
      %64 = vector.broadcast %c64_i32_33 : i32 to vector<1x128xi32>
      %65 = arith.cmpi slt, %63, %64 : vector<1x128xi32>
      %cst_34 = arith.constant 1.000000e+30 : f32
      %66 = vector.broadcast %cst_34 : f32 to vector<1x128xf32>
      %67 = arith.select %65, %62, %66 : vector<1x128xi1>, vector<1x128xf32>
      %c0_35 = arith.constant 0 : index
      %c0_36 = arith.constant 0 : index
      %68 = vector.load %arg9[%c0_35, %c0_36] : memref<1x128xf32, #tpu.memory_space<vmem>>, vector<1x128xf32>
      tpu.vector_store %arg9[%c0_35, %c0_36], %67 {strides = array<i32>} : memref<1x128xf32, #tpu.memory_space<vmem>>, vector<1x128xf32>,
      %cst_37 = arith.constant 0.000000e+00 : f32
      %c0_38 = arith.constant 0 : index
      %69 = memref.load %arg10[%c0_38] : memref<1xf32, #tpu.memory_space<smem>>
      memref.store %cst_37, %arg10[%c0_38] : memref<1xf32, #tpu.memory_space<smem>>
    } else {
    }
    %c0 = arith.constant 0 : index
    %c0_1 = arith.constant 0 : index
    %3 = vector.load %arg1[%c0, %c0_1] : memref<32x128xf32, #tpu.memory_space<vmem>>, vector<32x128xf32>
    %c0_2 = arith.constant 0 : index
    %c0_3 = arith.constant 0 : index
    %4 = vector.load %arg8[%c0_2, %c0_3] : memref<128x128xf32, #tpu.memory_space<vmem>>, vector<128x128xf32>
    %cst = arith.constant dense<0.000000e+00> : vector<32x128xf32>
    %5 = tpu.matmul %3, %4, %cst {dimension_numbers = #tpu.dot_dimension_numbers<[1], [1], [0], [0], [0, 0, 1, 0], [], []>} : vector<32x128xf32>, vector<128x128xf32>, vector<32x128xf32> -> vector<32x128xf32>
    %c0_4 = arith.constant 0 : index
    %c0_5 = arith.constant 0 : index
    %6 = vector.load %arg9[%c0_4, %c0_5] : memref<1x128xf32, #tpu.memory_space<vmem>>, vector<1x128xf32>
    %cst_6 = arith.constant 2.000000e+00 : f32
    %7 = vector.broadcast %cst_6 : f32 to vector<32x128xf32>
    %8 = arith.mulf %7, %5 : vector<32x128xf32>
    %9 = vector.broadcast %6 : vector<1x128xf32> to vector<32x128xf32>
    %10 = arith.subf %9, %8 : vector<32x128xf32>
    %11 = tpu.iota {dimensions = array<i32: 1>} : vector<32x128xi32>
    %cst_7 = arith.constant dense<0x7F800000> : vector<32xf32>
    %12 = vector.multi_reduction <minimumf>, %10, %cst_7 [1] : vector<32x128xf32> to vector<32xf32>
    %13 = vector.shape_cast %12 : vector<32xf32> to vector<32x1xf32>
    %14 = vector.broadcast %13 : vector<32x1xf32> to vector<32x128xf32>
    %15 = arith.cmpf ole, %10, %14 : vector<32x128xf32>
    %c128_i32 = arith.constant 128 : i32
    %16 = vector.broadcast %c128_i32 : i32 to vector<32x128xi32>
    %17 = arith.select %15, %11, %16 : vector<32x128xi1>, vector<32x128xi32>
    %cst_8 = arith.constant dense<2147483647> : vector<32xi32>
    %18 = vector.multi_reduction <minsi>, %17, %cst_8 [1] : vector<32x128xi32> to vector<32xi32>
    %19 = vector.shape_cast %18 : vector<32xi32> to vector<32x1xi32>
    %20 = vector.broadcast %19 : vector<32x1xi32> to vector<32x128xi32>
    %21 = arith.cmpi eq, %11, %20 : vector<32x128xi32>
    %22 = arith.extui %21 : vector<32x128xi1> to vector<32x128xi32>
    %23 = arith.sitofp %22 : vector<32x128xi32> to vector<32x128xf32>
    %cst_9 = arith.constant dense<0.000000e+00> : vector<32x128xf32>
    %24 = tpu.matmul %23, %4, %cst_9 {dimension_numbers = #tpu.dot_dimension_numbers<[1], [0], [0], [1], [0, 0, 1, 1], [], []>} : vector<32x128xf32>, vector<128x128xf32>, vector<32x128xf32> -> vector<32x128xf32>
    %25 = arith.subf %24, %3 : vector<32x128xf32>
    %26 = arith.addf %3, %25 : vector<32x128xf32>
    %c0_10 = arith.constant 0 : index
    %c0_11 = arith.constant 0 : index
    %27 = vector.load %arg5[%c0_10, %c0_11] : memref<32x128xf32, #tpu.memory_space<vmem>>, vector<32x128xf32>
    tpu.vector_store %arg5[%c0_10, %c0_11], %26 {strides = array<i32>} : memref<32x128xf32, #tpu.memory_space<vmem>>, vector<32x128xf32>,
    %28 = arith.mulf %25, %25 : vector<32x128xf32>
    %c0_12 = arith.constant 0 : index
    %29 = memref.load %arg10[%c0_12] : memref<1xf32, #tpu.memory_space<smem>>
    %30 = vector.shape_cast %28 : vector<32x128xf32> to vector<1x32x128xf32>
    %cst_13 = arith.constant dense<0.000000e+00> : vector<1xf32>
    %31 = vector.multi_reduction <add>, %30, %cst_13 [1, 2] : vector<1x32x128xf32> to vector<1xf32>
    %32 = vector.shape_cast %31 : vector<1xf32> to vector<1x1x1xf32>
    %33 = vector.extract %32[0, 0, 0] : f32 from vector<1x1x1xf32>
    %34 = arith.addf %29, %33 : f32
    %c0_14 = arith.constant 0 : index
    %35 = memref.load %arg10[%c0_14] : memref<1xf32, #tpu.memory_space<smem>>
    memref.store %34, %arg10[%c0_14] : memref<1xf32, #tpu.memory_space<smem>>
    %36 = tpu.iota {dimensions = array<i32: 1>} : vector<1x128xi32>
    %37 = arith.sitofp %36 : vector<1x128xi32> to vector<1x128xf32>
    %cst_15 = arith.constant dense<0.000000e+00> : vector<1x32xf32>
    %38 = tpu.matmul %37, %23, %cst_15 {dimension_numbers = #tpu.dot_dimension_numbers<[1], [1], [0], [0], [0, 0, 1, 0], [], []>} : vector<1x128xf32>, vector<32x128xf32>, vector<1x32xf32> -> vector<1x32xf32>
    %cst_16 = arith.constant 5.000000e-01 : f32
    %39 = vector.broadcast %cst_16 : f32 to vector<1x32xf32>
    %40 = arith.addf %38, %39 : vector<1x32xf32>
    %41 = arith.fptosi %40 : vector<1x32xf32> to vector<1x32xi32>
    %c0_17 = arith.constant 0 : index
    %c0_18 = arith.constant 0 : index
    %c0_19 = arith.constant 0 : index
    %42 = vector.load %arg6[%c0_17, %c0_18, %c0_19] : memref<1x1x32xi32, #tpu.memory_space<vmem>>, vector<1x1x32xi32>
    %43 = vector.shape_cast %42 : vector<1x1x32xi32> to vector<1x32xi32>
    %44 = vector.shape_cast %41 : vector<1x32xi32> to vector<1x1x32xi32>
    tpu.vector_store %arg6[%c0_17, %c0_18, %c0_19], %44 {strides = array<i32>} : memref<1x1x32xi32, #tpu.memory_space<vmem>>, vector<1x1x32xi32>,
    %c0_i32_20 = arith.constant 0 : i32
    %45 = arith.cmpi eq, %arg0, %c0_i32_20 : i32
    %46 = arith.extui %45 : i1 to i32
    %c0_i32_21 = arith.constant 0 : i32
    %47 = arith.cmpi ne, %46, %c0_i32_21 : i32
    scf.if %47 {
      %c0_22 = arith.constant 0 : index
      %48 = memref.load %arg10[%c0_22] : memref<1xf32, #tpu.memory_space<smem>>
      %cst_23 = arith.constant 0.00122070313 : f32
      %49 = arith.mulf %48, %cst_23 : f32
      %c0_24 = arith.constant 0 : index
      %50 = memref.load %arg7[%c0_24] : memref<1xf32, #tpu.memory_space<smem>>
      memref.store %49, %arg7[%c0_24] : memref<1xf32, #tpu.memory_space<smem>>
    } else {
    }
    return
  }
  func.func @transform_0(%arg0: i32) -> (i32, i32) {
    %c0_i32 = arith.constant 0 : i32
    %c0_i32_0 = arith.constant 0 : i32
    return %arg0, %c0_i32 : i32, i32
  }
  func.func @transform_1(%arg0: i32) -> (i32, i32) {
    %c0_i32 = arith.constant 0 : i32
    %c0_i32_0 = arith.constant 0 : i32
    %c0_i32_1 = arith.constant 0 : i32
    return %c0_i32, %c0_i32_0 : i32, i32
  }
  func.func @transform_2(%arg0: i32) -> (i32, i32) {
    %c0_i32 = arith.constant 0 : i32
    %c0_i32_0 = arith.constant 0 : i32
    %c0_i32_1 = arith.constant 0 : i32
    return %c0_i32, %c0_i32_0 : i32, i32
  }
  func.func @transform_3(%arg0: i32) -> (i32, i32) {
    %c0_i32 = arith.constant 0 : i32
    %c0_i32_0 = arith.constant 0 : i32
    %c0_i32_1 = arith.constant 0 : i32
    return %c0_i32, %c0_i32_0 : i32, i32
  }
  func.func @transform_4(%arg0: i32) -> (i32, i32) {
    %c0_i32 = arith.constant 0 : i32
    %c0_i32_0 = arith.constant 0 : i32
    return %arg0, %c0_i32 : i32, i32
  }
  func.func @transform_5(%arg0: i32) -> (i32, i32, i32) {
    %c0_i32 = arith.constant 0 : i32
    %c0_i32_0 = arith.constant 0 : i32
    %c0_i32_1 = arith.constant 0 : i32
    return %arg0, %c0_i32, %c0_i32_0 : i32, i32, i32
  }
  func.func @transform_6(%arg0: i32) -> i32 {
    %c0_i32 = arith.constant 0 : i32
    %c0_i32_0 = arith.constant 0 : i32
    return %c0_i32 : i32
  }
}

</mosaic_0001>

<bundles_post_ra>
// kernel: tpu_custom_call.1
= control target key start
LH: loop header
LB: loop body
LE: loop exit
PB: predicated region body
PF: predicated region fallthrough
CT: control target
= control target key end

     0   :  { %12 = vsyncpa [#allocation6], 0  ;;  %s1002_s0 = inlined_call_operand.hbm [shape: f32[32,128], index: 0, kind: input, shape index: {}]   ;;  %s1003_s1 = inlined_call_operand.hbm [shape: f32[128,128], index: 1, kind: input, shape index: {}]   ;;  %s1004_s2 = inlined_call_operand.hbm [shape: f32[128,128], index: 2, kind: input, shape index: {}]   ;;  %s1005_s3 = inlined_call_operand.vmem [shape: f32[1,128], index: 3, kind: input, shape index: {}]   ;;  %s1006_s4 = inlined_call_operand.hbm [shape: f32[32,128], index: 4, kind: output, shape index: {0}]   ;;  %s1007_s5 = inlined_call_operand.hbm [shape: s32[1,1,32], index: 5, kind: output, shape index: {1}]   ;;  %s1008_s6 = inlined_call_operand.hbm [shape: f32[1], index: 6, kind: output, shape index: {2}]  }
   0x1   :  { %13 = vsyncpa [#allocation10], 0 }
   0x2   :  { %14 = vsyncpa [#allocation7], 0 }
   0x3   :  { %15 = vsyncpa [#allocation14], 0 }
   0x4   :  { %16 = vsyncpa [#allocation8], 0  ;;  %s34_s23 = sshll.u32 %s1003_s1, 4  ;;  %s868_s24 = smov [#allocation9]   ;;  %s35_s23 = int_to_ptr.hbm [resolvable:$true] %s34_s23 }
   0x5   :  { %s36_s25 = sshll.u32 %s868_s24, 4  ;;  %s21_s28 = sshll.u32 %s1002_s0, 4  ;;  %s37_s25 = int_to_ptr.vmem [resolvable:$true] %s36_s25  ;;  %s22_s28 = int_to_ptr.hbm [resolvable:$true] %s21_s28 }
   0x6   :  { %s869_s29 = smov 128   ;;  %s870_s30 = smov 8  }
   0x7   :  { %42 = dma.hbm_to_vmem [thread:$0]  %s35_s23, 2048, %s37_s25, [#allocation10], %s869_s29, %s869_s29, %s870_s30  }
   0x8   :  { %s871_s7 = smov [#allocation5]   ;;  %s47_s1 = sshll.u32 %s1004_s2, 4  ;;  %s48_s1 = int_to_ptr.hbm [resolvable:$true] %s47_s1 }
   0x9   :  { %s23_s8 = sshll.u32 %s871_s7, 4  ;;  %s872_s0 = smov [#allocation11]   ;;  %s24_s8 = int_to_ptr.vmem [resolvable:$true] %s23_s8 }
   0xa   :  { %29 = dma.hbm_to_vmem [thread:$0]  %s22_s28, 512, %s24_s8, [#allocation6], %s869_s29, %s869_s29, %s870_s30  }
   0xb   :  { %s49_s11 = sshll.u32 %s872_s0, 4  ;;  %s50_s11 = int_to_ptr.vmem [resolvable:$true] %s49_s11 }
   0xc   :  { %55 = dma.hbm_to_vmem [thread:$0]  %s48_s1, 2048, %s50_s11, [#allocation10], %s869_s29, %s869_s29, %s870_s30  }
   0xd   :  { %858 = dma.done.wait [#allocation6], 512  }
   0xe   :  { %859 = vsyncadd [#allocation6], 4294966784 }
   0xf   :  { %860 = dma.done.wait [#allocation10], 4096  }
  0x10   :  { %861 = vsyncadd [#allocation10], 4294963200  ;;  %v105_v0 = vld [vmem:[#allocation11 + $0x78] sm:$0xff]  ;;  %v104_v1 = vld [vmem:[#allocation11 + $0x70] sm:$0xff]  ;;  %v873_v18 = vmov 0.0   ;;  %v288_v59 = vlaneseq  ;;  %vm310_vm0 = vcmask 130112  }
  0x11   :  { %110 = vmatpush.xpose.msra.mxu0 %v105_v0  ;;  %675 = vmatpush.xpose.msra.mxu2 %v105_v0  ;;  %v103_v2 = vld [vmem:[#allocation11 + $0x68] sm:$0xff]  ;;  %v102_v3 = vld [vmem:[#allocation11 + $0x60] sm:$0xff]  ;;  %v101_v4 = vld [vmem:[#allocation11 + $0x58] sm:$0xff]  ;;  %vm314_vm1 = vcmask 195712   ;;  %vm318_vm2 = vcmask 261312   ;;  %vm322_vm3 = vcmask 326912  }
  0x12   :  { %676 = vmatpush.xpose.msra.mxu3 %v105_v0  ;;  %v100_v5 = vld [vmem:[#allocation11 + $0x50] sm:$0xff]  ;;  %v99_v6 = vld [vmem:[#allocation11 + $0x48] sm:$0xff]  ;;  %v98_v7 = vld [vmem:[#allocation11 + $0x40] sm:$0xff]  ;;  %274 = vadd.xlane.f32.xlu0 %v873_v18  ;;  %v946_v60 = vand.u32 127, %v288_v59  ;;  %vm326_vm4 = vcmask 392512   ;;  %vm330_vm5 = vcmask 458112  }
  0x13   :  { %v97_v8 = vld [vmem:[#allocation11 + $0x38] sm:$0xff]  ;;  %v96_v9 = vld [vmem:[#allocation11 + $0x30] sm:$0xff]  ;;  %v95_v10 = vld [vmem:[#allocation11 + $0x28] sm:$0xff]  ;;  %272 = vadd.xlane.f32.xlu2 %v873_v18  ;;  %vm334_vm6 = vcmask 523712   ;;  %vm338_vm7 = vcmask 589312   ;;  %vm342_vm8 = vcmask 654912  }
  0x14   :  { %v94_v11 = vld [vmem:[#allocation11 + $0x20] sm:$0xff]  ;;  %v93_v12 = vld [vmem:[#allocation11 + $0x18] sm:$0xff]  ;;  %v92_v13 = vld [vmem:[#allocation11 + $0x10] sm:$0xff]  ;;  %v308_v63 = vadd.s32 4294967288, %v946_v60  ;;  %v312_v0 = vadd.s32 4294967280, %v946_v60  ;;  %vm346_vm9 = vcmask 720512  }
  0x15   :  { %111 = vmatpush.xpose.msra.mxu0 %v104_v1  ;;  %677 = vmatpush.xpose.msra.mxu2 %v104_v1  ;;  %v91_v14 = vld [vmem:[#allocation11 + $0x8] sm:$0xff]  ;;  %v90_v15 = vld [vmem:[#allocation11] sm:$0xff]  ;;  %v80_v20 = vld [vmem:[#allocation9 + $0x30] sm:$0xff]  ;;  %vm350_vm10 = vcmask 786112   ;;  %vm354_vm11 = vcmask 851712   ;;  %vm358_vm12 = vcmask 917312  }
  0x16   :  { %678 = vmatpush.xpose.msra.mxu3 %v104_v1  ;;  %v74_v16 = vld [vmem:[#allocation9] sm:$0xff]  ;;  %v79_v17 = vld [vmem:[#allocation9 + $0x28] sm:$0xff]  ;;  %v76_v21 = vld [vmem:[#allocation9 + $0x10] sm:$0xff]  ;;  %vm362_vm13 = vcmask 982912   ;;  %vm366_vm14 = vcmask 1048512   ;;  %vm290_vm15 = vcmp.lt.s32.totalorder %v946_v60, 64 }
  0x17   :  { %v75_v19 = vld [vmem:[#allocation9 + $0x8] sm:$0xff]  ;;  %v81_v22 = vld [vmem:[#allocation9 + $0x38] sm:$0xff]  ;;  %v78_v24 = vld [vmem:[#allocation9 + $0x20] sm:$0xff]  ;;  %s618_s16 = sshll.u32 %s1006_s4, 4  ;;  %s876_s4 = smov [#allocation13]   ;;  %s619_s16 = int_to_ptr.hbm [resolvable:$true] %s618_s16 }
  0x18   :  { %v77_v23 = vld [vmem:[#allocation9 + $0x18] sm:$0xff]  ;;  %v934_v50 = vld [vmem:[#allocation5] sm:$0xff]  ;;  %v937_v51 = vld [vmem:[#allocation5 + $0x8] sm:$0xff]  ;;  %s630_s17 = sshll.u32 %s876_s4, 4  ;;  %s632_s20 = sshll.u32 %s1007_s5, 4  ;;  %s631_s17 = int_to_ptr.vmem [resolvable:$true] %s630_s17  ;;  %s633_s20 = int_to_ptr.hbm [resolvable:$true] %s632_s20 }
  0x19   :  { %112 = vmatpush.xpose.msra.mxu0 %v103_v2  ;;  %679 = vmatpush.xpose.msra.mxu2 %v103_v2  ;;  %v724_v25 = vld [vmem:[%s1005_s3] ss:$0 sm:$0xff]  ;;  %v940_v52 = vld [vmem:[#allocation5 + $0x10] sm:$0xff]  ;;  %s875_s3 = smov [#allocation12]   ;;  %s641_s23 = sshll.u32 %s1008_s6, 4  ;;  %s642_s23 = int_to_ptr.hbm [resolvable:$true] %s641_s23 }
  0x1a   :  { %680 = vmatpush.xpose.msra.mxu3 %v103_v2  ;;  %v943_v53 = vld [vmem:[#allocation5 + $0x18] sm:$0xff]  ;;  %s616_s13 = sshll.u32 %s875_s3, 4  ;;  %s877_s26 = smov [#allocation15]   ;;  %s617_s13 = int_to_ptr.vmem [resolvable:$true] %s616_s13 }
  0x1d   :  { %113 = vmatpush.xpose.msra.mxu0 %v102_v3  ;;  %681 = vmatpush.xpose.msra.mxu2 %v102_v3 }
  0x1e   :  { %682 = vmatpush.xpose.msra.mxu3 %v102_v3  ;;  %v316_v3 = vadd.s32 4294967272, %v946_v60 }
  0x21   :  { %114 = vmatpush.xpose.msra.mxu0 %v101_v4  ;;  %683 = vmatpush.xpose.msra.mxu2 %v101_v4 }
  0x22   :  { %684 = vmatpush.xpose.msra.mxu3 %v101_v4 }
  0x25   :  { %115 = vmatpush.xpose.msra.mxu0 %v100_v5  ;;  %685 = vmatpush.xpose.msra.mxu2 %v100_v5 }
  0x26   :  { %686 = vmatpush.xpose.msra.mxu3 %v100_v5  ;;  %v320_v5 = vadd.s32 4294967264, %v946_v60 }
  0x29   :  { %116 = vmatpush.xpose.msra.mxu0 %v99_v6  ;;  %687 = vmatpush.xpose.msra.mxu2 %v99_v6 }
  0x2a   :  { %688 = vmatpush.xpose.msra.mxu3 %v99_v6 }
  0x2d   :  { %117 = vmatpush.xpose.msra.mxu0 %v98_v7  ;;  %689 = vmatpush.xpose.msra.mxu2 %v98_v7 }
  0x2e   :  { %690 = vmatpush.xpose.msra.mxu3 %v98_v7  ;;  %v324_v7 = vadd.s32 4294967256, %v946_v60 }
  0x31   :  { %118 = vmatpush.xpose.msra.mxu0 %v97_v8  ;;  %691 = vmatpush.xpose.msra.mxu2 %v97_v8 }
  0x32   :  { %692 = vmatpush.xpose.msra.mxu3 %v97_v8  ;;  %v328_v8 = vadd.s32 4294967248, %v946_v60 }
  0x35   :  { %119 = vmatpush.xpose.msra.mxu0 %v96_v9  ;;  %693 = vmatpush.xpose.msra.mxu2 %v96_v9 }
  0x36   :  { %694 = vmatpush.xpose.msra.mxu3 %v96_v9 }
  0x39   :  { %120 = vmatpush.xpose.msra.mxu0 %v95_v10  ;;  %695 = vmatpush.xpose.msra.mxu2 %v95_v10 }
  0x3a   :  { %696 = vmatpush.xpose.msra.mxu3 %v95_v10 }
  0x3d   :  { %121 = vmatpush.xpose.msra.mxu0 %v94_v11  ;;  %697 = vmatpush.xpose.msra.mxu2 %v94_v11 }
  0x3e   :  { %698 = vmatpush.xpose.msra.mxu3 %v94_v11  ;;  %v332_v11 = vadd.s32 4294967240, %v946_v60 }
  0x41   :  { %122 = vmatpush.xpose.msra.mxu0 %v93_v12  ;;  %699 = vmatpush.xpose.msra.mxu2 %v93_v12 }
  0x42   :  { %700 = vmatpush.xpose.msra.mxu3 %v93_v12 }
  0x45   :  { %123 = vmatpush.xpose.msra.mxu0 %v92_v13  ;;  %701 = vmatpush.xpose.msra.mxu2 %v92_v13 }
  0x46   :  { %702 = vmatpush.xpose.msra.mxu3 %v92_v13 }
  0x49   :  { %124 = vmatpush.xpose.msra.mxu0 %v91_v14  ;;  %703 = vmatpush.xpose.msra.mxu2 %v91_v14 }
  0x4a   :  { %704 = vmatpush.xpose.msra.mxu3 %v91_v14  ;;  %v336_v14 = vadd.s32 4294967232, %v946_v60 }
  0x4d   :  { %125 = vmatpush.xpose.msra.mxu0 %v90_v15  ;;  %705 = vmatpush.xpose.msra.mxu2 %v90_v15 }
  0x4e   :  { %706 = vmatpush.xpose.msra.mxu3 %v90_v15 }
  0x50   :  { %126 = vmatmul.f32.vlgmr.msra.gmra.mxu0 %v74_v16  ;;  %141 = vmatmul.f32.vlgmr.msra.gmra.mxu2 %v79_v17  ;;  %v340_v17 = vadd.s32 4294967224, %v946_v60 }
  0x58   :  { %129 = vmatmul.f32.gmra.mxu0 %v75_v19  ;;  %144 = vmatmul.f32.gmra.mxu2 %v80_v20 }
  0x60   :  { %132 = vmatmul.f32.gmra.mxu0 %v76_v21  ;;  %147 = vmatmul.f32.gmra.mxu2 %v81_v22 }
  0x68   :  { %135 = vmatmul.f32.gmra.mxu0 %v77_v23 }
  0x70   :  { %138 = vmatmul.f32.gmra.mxu0 %v78_v24 }
  0x85   :  { %v275_v54 = vpop.xlane.xlu0 %274 }
  0x86   :  { %v273_v56 = vpop.xlane.xlu2 %272 }
  0xcd   :  { %v127_v26 = vpop.f32.mrf.mxu0 }
  0xce   :  { %v128_v27 = vadd.f32 %v724_v25, %v127_v26  ;;  %v337_v26 = vperm.slane %v273_v56, %v336_v14 }
  0xd0   :  { %v240_v28 = vmul.f32 %v128_v27, %v128_v27 }
  0xd2   :  { %256 = vadd.xlane.f32.xlu0 %v240_v28  ;;  %v341_v28 = vperm.slane %v275_v54, %v340_v17 }
  0xd3   :  { %v142_v29 = vpop.f32.mrf.mxu2 }
  0xd4   :  { %v143_v30 = vadd.f32 %v724_v25, %v142_v29 }
  0xd5   :  { %v130_v31 = vpop.f32.mrf.mxu0 }
  0xd6   :  { %v131_v32 = vadd.f32 %v724_v25, %v130_v31  ;;  %v245_v33 = vmul.f32 %v143_v30, %v143_v30 }
  0xd8   :  { %266 = vadd.xlane.f32.xlu2 %v245_v33  ;;  %v241_v34 = vmul.f32 %v131_v32, %v131_v32 }
  0xda   :  { %258 = vadd.xlane.f32.xlu0 %v241_v34 }
  0xdb   :  { %v145_v35 = vpop.f32.mrf.mxu2 }
  0xdc   :  { %v146_v36 = vadd.f32 %v724_v25, %v145_v35 }
  0xdd   :  { %v133_v37 = vpop.f32.mrf.mxu0 }
  0xde   :  { %v134_v38 = vadd.f32 %v724_v25, %v133_v37  ;;  %v246_v40 = vmul.f32 %v146_v36, %v146_v36 }
  0xe0   :  { %v242_v39 = vmul.f32 %v134_v38, %v134_v38 }
  0xe2   :  { %260 = vadd.xlane.f32.xlu1 %v242_v39  ;;  %268 = vadd.xlane.f32.xlu0 %v246_v40  ;;  %v356_v39 = vadd.s32 4294967192, %v946_v60  ;;  %v364_v40 = vadd.s32 4294967176, %v946_v60 }
  0xe3   :  { %v148_v41 = vpop.f32.mrf.mxu2 }
  0xe4   :  { %v149_v42 = vadd.f32 %v724_v25, %v148_v41 }
  0xe5   :  { %v136_v43 = vpop.f32.mrf.mxu0 }
  0xe6   :  { %401 = vmatpush.xpose.msra.mxu1 %v149_v42  ;;  %v247_v44 = vmul.f32 %v149_v42, %v149_v42  ;;  %v137_v45 = vadd.f32 %v724_v25, %v136_v43 }
  0xe8   :  { %v243_v48 = vmul.f32 %v137_v45, %v137_v45 }
  0xea   :  { %402 = vmatpush.xpose.msra.mxu1 %v146_v36  ;;  %270 = vadd.xlane.f32.xlu1 %v247_v44 }
  0xeb   :  { %280 = vadd.xlane.f32.xlu0 %v873_v18 }
  0xed   :  { %v139_v46 = vpop.f32.mrf.mxu0 }
  0xee   :  { %v140_v47 = vadd.f32 %v724_v25, %v139_v46  ;;  %403 = vmatpush.xpose.msra.mxu1 %v143_v30  ;;  %v344_v25 = vadd.s32 4294967216, %v946_v60 }
  0xf0   :  { %v244_v49 = vmul.f32 %v140_v47, %v140_v47 }
  0xf2   :  { %404 = vmatpush.xpose.msra.mxu1 %v140_v47  ;;  %262 = vadd.xlane.f32.xlu1 %v243_v48 }
  0xf3   :  { %264 = vadd.xlane.f32.xlu2 %v244_v49  ;;  %286 = vadd.xlane.f32.xlu0 %v873_v18 }
  0xf6   :  { %405 = vmatpush.xpose.msra.mxu1 %v137_v45 }
  0xfa   :  { %406 = vmatpush.xpose.msra.mxu1 %v134_v38  ;;  %276 = vadd.xlane.f32.xlu1 %v873_v18 }
  0xfb   :  { %278 = vadd.xlane.f32.xlu2 %v873_v18 }
  0xfe   :  { %407 = vmatpush.xpose.msra.mxu1 %v131_v32 }
 0x102   :  { %282 = vadd.xlane.f32.xlu1 %v873_v18  ;;  %408 = vmatpush.xpose.msra.mxu1 %v128_v27 }
 0x103   :  { %284 = vadd.xlane.f32.xlu2 %v873_v18 }
 0x105   :  { %409 = vmatmul.f32.vlgmr.msra.gmra.mxu1 %v934_v50 }
 0x106   :  { %528 = vmatpush.msrb.mxu1 %v149_v42  ;;  %v360_v42 = vadd.s32 4294967184, %v946_v60 }
 0x108   :  { %529 = vmatpush.msrb.mxu1 %v146_v36  ;;  %v352_v36 = vadd.s32 4294967200, %v946_v60 }
 0x10a   :  { %530 = vmatpush.msrb.mxu1 %v143_v30  ;;  %v348_v30 = vadd.s32 4294967208, %v946_v60 }
 0x10c   :  { %531 = vmatpush.msrb.mxu1 %v140_v47 }
 0x10d   :  { %412 = vmatmul.f32.gmra.mxu1 %v937_v51 }
 0x10e   :  { %532 = vmatpush.msrb.mxu1 %v137_v45 }
 0x110   :  { %533 = vmatpush.msrb.mxu1 %v134_v38 }
 0x112   :  { %534 = vmatpush.msrb.mxu1 %v131_v32 }
 0x114   :  { %535 = vmatpush.msrb.mxu1 %v128_v27 }
 0x115   :  { %415 = vmatmul.f32.gmra.mxu1 %v940_v52 }
 0x11d   :  { %418 = vmatmul.f32.gmra.mxu1 %v943_v53 }
 0x145   :  { %v257_v55 = vpop.xlane.xlu0 %256 }
 0x146   :  { %v307_v6 = vperm.slane %v257_v55, %v946_v60 }
 0x14b   :  { %v267_v62 = vpop.xlane.xlu2 %266 }
 0x14c   :  { %v325_v18 = vperm.slane %v267_v62, %v324_v7 }
 0x14d   :  { %v259_v58 = vpop.xlane.xlu0 %258 }
 0x14e   :  { %v309_v2 = vperm.slane %v259_v58, %v308_v63 }
 0x150   :  { %v311_v10 = vsel %vm310_vm0, %v309_v2, %v307_v6 }
 0x155   :  { %v261_v57 = vpop.xlane.xlu1 %260  ;;  %v269_v1 = vpop.xlane.xlu0 %268 }
 0x156   :  { %v313_v4 = vperm.slane %v261_v57, %v312_v0  ;;  %v329_v20 = vperm.slane %v269_v1, %v328_v8 }
 0x158   :  { %v315_v15 = vsel %vm314_vm1, %v313_v4, %v311_v10 }
 0x15d   :  { %v271_v61 = vpop.xlane.xlu1 %270 }
 0x15e   :  { %v281_v22 = vpop.xlane.xlu0 %280  ;;  %v333_v23 = vperm.slane %v271_v61, %v332_v11 }
 0x15f   :  { %v353_v41 = vperm.slane %v281_v22, %v352_v36 }
 0x165   :  { %v263_v9 = vpop.xlane.xlu1 %262 }
 0x166   :  { %v317_v12 = vperm.slane %v263_v9, %v316_v3  ;;  %v265_v13 = vpop.xlane.xlu2 %264  ;;  %v287_v43 = vpop.xlane.xlu0 %286 }
 0x167   :  { %v321_v16 = vperm.slane %v265_v13, %v320_v5  ;;  %v365_v48 = vperm.slane %v287_v43, %v364_v40 }
 0x168   :  { %v319_v19 = vsel %vm318_vm2, %v317_v12, %v315_v15 }
 0x169   :  { %v323_v21 = vsel %vm322_vm3, %v321_v16, %v319_v19 }
 0x16a   :  { %v327_v24 = vsel %vm326_vm4, %v325_v18, %v323_v21 }
 0x16b   :  { %v331_v27 = vsel %vm330_vm5, %v329_v20, %v327_v24 }
 0x16c   :  { %v335_v29 = vsel %vm334_vm6, %v333_v23, %v331_v27 }
 0x16d   :  { %v277_v31 = vpop.xlane.xlu1 %276  ;;  %v339_v32 = vsel %vm338_vm7, %v337_v26, %v335_v29 }
 0x16e   :  { %v343_v33 = vsel %vm342_vm8, %v341_v28, %v339_v32  ;;  %v345_v34 = vperm.slane %v277_v31, %v344_v25  ;;  %v279_v35 = vpop.xlane.xlu2 %278 }
 0x16f   :  { %v349_v37 = vperm.slane %v279_v35, %v348_v30 }
 0x170   :  { %v347_v38 = vsel %vm346_vm9, %v345_v34, %v343_v33 }
 0x171   :  { %v351_v44 = vsel %vm350_vm10, %v349_v37, %v347_v38 }
 0x172   :  { %v355_v49 = vsel %vm354_vm11, %v353_v41, %v351_v44 }
 0x175   :  { %v283_v45 = vpop.xlane.xlu1 %282 }
 0x176   :  { %v357_v46 = vperm.slane %v283_v45, %v356_v39  ;;  %v285_v47 = vpop.xlane.xlu2 %284 }
 0x177   :  { %v361_v54 = vperm.slane %v285_v47, %v360_v42  ;;  %v874_v47 = vmov 1.0  }
 0x178   :  { %v359_v55 = vsel %vm358_vm12, %v357_v46, %v355_v49 }
 0x179   :  { %v363_v56 = vsel %vm362_vm13, %v361_v54, %v359_v55  ;;  %vm603_vm13 = vcmask 253952  }
 0x17a   :  { %v367_v57 = vsel %vm366_vm14, %v365_v48, %v363_v56 }
 0x17b   :  { %v369_v58 = vsel %vm290_vm15, %v367_v57, 1e+30 }
 0x17c   :  { %370 = vst [vmem:[#allocation3] sm:$0x1] %v369_v58 }
 0x182   :  { %v410_v59 = vpop.f32.mrf.mxu1 }
 0x183   :  { %v423_v61 = vmul.f32 2.0, %v410_v59  ;;  %v725_v62 = vld [vmem:[#allocation3] ss:$0 sm:$0xff] }
 0x185   :  { %v430_v63 = vsub.f32 %v725_v62, %v423_v61 }
 0x187   :  { %436 = vmin.xlane.f32.xlu1 %v430_v63 }
 0x18a   :  { %v413_v0 = vpop.f32.mrf.mxu1 }
 0x18b   :  { %v424_v1 = vmul.f32 2.0, %v413_v0 }
 0x18d   :  { %v431_v2 = vsub.f32 %v725_v62, %v424_v1 }
 0x18f   :  { %438 = vmin.xlane.f32.xlu2 %v431_v2 }
 0x192   :  { %v416_v3 = vpop.f32.mrf.mxu1 }
 0x193   :  { %v425_v4 = vmul.f32 2.0, %v416_v3  ;;  %v85_v3 = vld [vmem:[#allocation9 + $0x58] sm:$0xff] }
 0x194   :  { %159 = vmatmul.f32.vlgmr.msra.gmra.mxu3 %v85_v3 }
 0x195   :  { %v432_v5 = vsub.f32 %v725_v62, %v425_v4 }
 0x197   :  { %440 = vmin.xlane.f32.xlu0 %v432_v5 }
 0x19a   :  { %v419_v6 = vpop.f32.mrf.mxu1 }
 0x19b   :  { %v426_v7 = vmul.f32 2.0, %v419_v6 }
 0x19d   :  { %v433_v8 = vsub.f32 %v725_v62, %v426_v7 }
 0x19f   :  { %442 = vmin.xlane.f32.xlu1 %v433_v8 }
 0x1fa   :  { %v437_v9 = vpop.xlane.xlu1 %436 }
 0x1fb   :  { %vm444_vm0 = vcmp.le.f32.partialorder %v430_v63, %v437_v9  ;;  %v83_v9 = vld [vmem:[#allocation9 + $0x48] sm:$0xff] }
 0x1fc   :  { %v448_v10 = vsel %vm444_vm0, %v946_v60, 128 }
 0x1fd   :  { %v453_v11 = vshra.s32 %v448_v10, 16  ;;  %v452_v25 = vand.u32 65535, %v448_v10 }
 0x1ff   :  { %v455_v12 = vcvt.s32.f32 %v453_v11  ;;  %v454_v27 = vcvt.s32.f32 %v452_v25 }
 0x201   :  { %456 = vmin.xlane.f32.xlu2 %v455_v12 }
 0x202   :  { %v439_v13 = vpop.xlane.xlu2 %438 }
 0x203   :  { %vm445_vm1 = vcmp.le.f32.partialorder %v431_v2, %v439_v13  ;;  %v87_v13 = vld [vmem:[#allocation9 + $0x68] sm:$0xff] }
 0x204   :  { %v449_v14 = vsel %vm445_vm1, %v946_v60, 128 }
 0x205   :  { %v467_v15 = vshra.s32 %v449_v14, 16  ;;  %v466_v29 = vand.u32 65535, %v449_v14  ;;  %v84_v14 = vld [vmem:[#allocation9 + $0x50] sm:$0xff] }
 0x207   :  { %v469_v16 = vcvt.s32.f32 %v467_v15  ;;  %v468_v31 = vcvt.s32.f32 %v466_v29 }
 0x209   :  { %470 = vmin.xlane.f32.xlu0 %v469_v16 }
 0x20a   :  { %v441_v17 = vpop.xlane.xlu0 %440 }
 0x20b   :  { %vm446_vm2 = vcmp.le.f32.partialorder %v432_v5, %v441_v17  ;;  %v82_v5 = vld [vmem:[#allocation9 + $0x40] sm:$0xff]  ;;  %v88_v17 = vld [vmem:[#allocation9 + $0x70] sm:$0xff] }
 0x20c   :  { %v450_v18 = vsel %vm446_vm2, %v946_v60, 128  ;;  %150 = vmatmul.f32.gmra.mxu2 %v82_v5 }
 0x20d   :  { %v481_v19 = vshra.s32 %v450_v18, 16  ;;  %v480_v33 = vand.u32 65535, %v450_v18 }
 0x20f   :  { %v483_v20 = vcvt.s32.f32 %v481_v19  ;;  %v482_v35 = vcvt.s32.f32 %v480_v33 }
 0x211   :  { %484 = vmin.xlane.f32.xlu1 %v483_v20 }
 0x212   :  { %v443_v21 = vpop.xlane.xlu1 %442 }
 0x213   :  { %vm447_vm3 = vcmp.le.f32.partialorder %v433_v8, %v443_v21  ;;  %v86_v8 = vld [vmem:[#allocation9 + $0x60] sm:$0xff] }
 0x214   :  { %v451_v22 = vsel %vm447_vm3, %v946_v60, 128  ;;  %162 = vmatmul.f32.gmra.mxu3 %v86_v8  ;;  %153 = vmatmul.f32.gmra.mxu2 %v83_v9 }
 0x215   :  { %v495_v23 = vshra.s32 %v451_v22, 16  ;;  %v494_v37 = vand.u32 65535, %v451_v22 }
 0x217   :  { %v497_v24 = vcvt.s32.f32 %v495_v23  ;;  %v496_v39 = vcvt.s32.f32 %v494_v37 }
 0x219   :  { %498 = vmin.xlane.f32.xlu2 %v497_v24 }
 0x21c   :  { %165 = vmatmul.f32.gmra.mxu3 %v87_v13  ;;  %156 = vmatmul.f32.gmra.mxu2 %v84_v14 }
 0x224   :  { %168 = vmatmul.f32.gmra.mxu3 %v88_v17 }
 0x274   :  { %v457_v26 = vpop.xlane.xlu2 %456 }
 0x275   :  { %vm458_vm4 = vcmp.eq.f32.partialorder %v455_v12, %v457_v26  ;;  %v463_v41 = vcvt.f32.s32 %v457_v26  ;;  %v89_v26 = vld [vmem:[#allocation9 + $0x78] sm:$0xff] }
 0x276   :  { %v459_v28 = vsel %vm458_vm4, %v454_v27, inf  ;;  %171 = vmatmul.f32.gmra.mxu3 %v89_v26 }
 0x277   :  { %460 = vmin.xlane.f32.xlu0 %v459_v28  ;;  %v464_v43 = vshll.u32 %v463_v41, 16 }
 0x27c   :  { %v471_v30 = vpop.xlane.xlu0 %470 }
 0x27d   :  { %vm472_vm5 = vcmp.eq.f32.partialorder %v469_v16, %v471_v30  ;;  %v477_v46 = vcvt.f32.s32 %v471_v30 }
 0x27e   :  { %v473_v32 = vsel %vm472_vm5, %v468_v31, inf }
 0x27f   :  { %474 = vmin.xlane.f32.xlu1 %v473_v32  ;;  %v478_v49 = vshll.u32 %v477_v46, 16 }
 0x284   :  { %v485_v34 = vpop.xlane.xlu1 %484 }
 0x285   :  { %vm486_vm6 = vcmp.eq.f32.partialorder %v483_v20, %v485_v34  ;;  %v491_v56 = vcvt.f32.s32 %v485_v34 }
 0x286   :  { %v487_v36 = vsel %vm486_vm6, %v482_v35, inf }
 0x287   :  { %488 = vmin.xlane.f32.xlu2 %v487_v36  ;;  %v492_v58 = vshll.u32 %v491_v56, 16 }
 0x28c   :  { %v499_v38 = vpop.xlane.xlu2 %498 }
 0x28d   :  { %vm500_vm7 = vcmp.eq.f32.partialorder %v497_v24, %v499_v38  ;;  %v505_v62 = vcvt.f32.s32 %v499_v38 }
 0x28e   :  { %v501_v40 = vsel %vm500_vm7, %v496_v39, inf }
 0x28f   :  { %502 = vmin.xlane.f32.xlu0 %v501_v40  ;;  %v506_v0 = vshll.u32 %v505_v62, 16  ;;  %v151_v28 = vpop.f32.mrf.mxu2 }
 0x297   :  { %v154_v30 = vpop.f32.mrf.mxu2 }
 0x29f   :  { %v157_v33 = vpop.f32.mrf.mxu2 }
 0x2ea   :  { %v461_v42 = vpop.xlane.xlu0 %460 }
 0x2eb   :  { %v462_v44 = vcvt.f32.s32 %v461_v42 }
 0x2ed   :  { %v465_v45 = vadd.s32 %v464_v43, %v462_v44 }
 0x2ef   :  { %vm508_vm8 = vcmp.eq.s32.totalorder %v946_v60, %v465_v45 }
 0x2f0   :  { %667 = vmatmul.msk.f32.vlgmr.msrb.gmra.mxu1 %vm508_vm8, %v874_v47 }
 0x2f2   :  { %v475_v48 = vpop.xlane.xlu1 %474 }
 0x2f3   :  { %v476_v54 = vcvt.f32.s32 %v475_v48 }
 0x2f5   :  { %v479_v55 = vadd.s32 %v478_v49, %v476_v54 }
 0x2f7   :  { %vm509_vm9 = vcmp.eq.s32.totalorder %v946_v60, %v479_v55 }
 0x2f8   :  { %668 = vmatmul.msk.f32.gmra.mxu1 %vm509_vm9, %v874_v47 }
 0x2fa   :  { %v489_v57 = vpop.xlane.xlu2 %488 }
 0x2fb   :  { %v490_v59 = vcvt.f32.s32 %v489_v57 }
 0x2fd   :  { %v493_v61 = vadd.s32 %v492_v58, %v490_v59 }
 0x2ff   :  { %vm510_vm10 = vcmp.eq.s32.totalorder %v946_v60, %v493_v61 }
 0x300   :  { %669 = vmatmul.msk.f32.gmra.mxu1 %vm510_vm10, %v874_v47 }
 0x302   :  { %v503_v63 = vpop.xlane.xlu0 %502 }
 0x303   :  { %v504_v1 = vcvt.f32.s32 %v503_v63 }
 0x305   :  { %v507_v2 = vadd.s32 %v506_v0, %v504_v1 }
 0x307   :  { %vm511_vm11 = vcmp.eq.s32.totalorder %v946_v60, %v507_v2 }
 0x308   :  { %671 = vmatpush.xpose.msk.msrb.mxu3 %vm511_vm11, %v874_v47  ;;  %670 = vmatmul.msk.f32.gmra.mxu1 %vm511_vm11, %v874_v47 }
 0x30c   :  { %672 = vmatpush.xpose.msk.msrb.mxu3 %vm510_vm10, %v874_v47 }
 0x310   :  { %673 = vmatpush.xpose.msk.msrb.mxu3 %vm509_vm9, %v874_v47 }
 0x314   :  { %674 = vmatpush.xpose.msk.msrb.mxu3 %vm508_vm8, %v874_v47 }
 0x36d   :  { %v537_v4 = vpop.f32.mrf.mxu1 }
 0x36e   :  { %v549_v6 = vsub.f32 %v537_v4, %v934_v50 }
 0x370   :  { %v553_v7 = vadd.f32 %v549_v6, %v934_v50  ;;  %v561_v19 = vmul.f32 %v549_v6, %v549_v6 }
 0x372   :  { %557 = vst [vmem:[#allocation12] sm:$0xff] %v553_v7 }
 0x375   :  { %v540_v10 = vpop.f32.mrf.mxu1 }
 0x376   :  { %v550_v11 = vsub.f32 %v540_v10, %v937_v51 }
 0x378   :  { %v554_v12 = vadd.f32 %v550_v11, %v937_v51  ;;  %v562_v18 = vmul.f32 %v550_v11, %v550_v11 }
 0x37a   :  { %558 = vst [vmem:[#allocation12 + $0x8] sm:$0xff] %v554_v12  ;;  %v566_v22 = vadd.f32 %v562_v18, %v561_v19 }
 0x37d   :  { %v543_v15 = vpop.f32.mrf.mxu1 }
 0x37e   :  { %v551_v16 = vsub.f32 %v543_v15, %v940_v52 }
 0x380   :  { %v555_v50 = vadd.f32 %v551_v16, %v940_v52  ;;  %v563_v20 = vmul.f32 %v551_v16, %v551_v16  ;;  %v581_v52 = vcvt.s32.f32 %v946_v60 }
 0x382   :  { %559 = vst [vmem:[#allocation12 + $0x10] sm:$0xff] %v555_v50  ;;  %v567_v25 = vadd.f32 %v566_v22, %v563_v20  ;;  %598 = vmatmul.f32.vlgmr.msrb.gmra.mxu3 %v581_v52 }
 0x385   :  { %v546_v21 = vpop.f32.mrf.mxu1 }
 0x386   :  { %v552_v51 = vsub.f32 %v546_v21, %v943_v53 }
 0x388   :  { %v556_v23 = vadd.f32 %v552_v51, %v943_v53  ;;  %v564_v24 = vmul.f32 %v552_v51, %v552_v51  ;;  %v160_v53 = vpop.f32.mrf.mxu3 }
 0x38a   :  { %560 = vst [vmem:[#allocation12 + $0x18] sm:$0xff] %v556_v23  ;;  %v568_v27 = vadd.f32 %v567_v25, %v564_v24 }
 0x38b   :  { %624 = dma.vmem_to_hbm [thread:$0]  %s617_s13, 512, %s619_s16, [#allocation7], %s869_s29, %s869_s29, %s870_s30  }
 0x38c   :  { %569 = vadd.xlane.f32.xlu1 %v568_v27 }
 0x390   :  { %v163_v29 = vpop.f32.mrf.mxu3 }
 0x398   :  { %v166_v31 = vpop.f32.mrf.mxu3 }
 0x3a0   :  { %v169_v37 = vpop.f32.mrf.mxu3 }
 0x3a8   :  { %v172_v40 = vpop.f32.mrf.mxu3 }
 0x3ff   :  { %v570_v32 = vpop.xlane.xlu1 %569 }
 0x400   :  { %v571_v60 = vrot.slane %v570_v32, 4 }
 0x402   :  { %v572_v34 = vadd.f32 %v571_v60, %v570_v32 }
 0x404   :  { %v573_v35 = vrot.slane %v572_v34, 2 }
 0x405   :  { %v599_v41 = vpop.f32.mrf.mxu3 }
 0x406   :  { %v574_v36 = vadd.f32 %v573_v35, %v572_v34  ;;  %v600_v42 = vadd.f32 0.5, %v599_v41 }
 0x408   :  { %v575_v38 = vrot.slane %v574_v36, 1  ;;  %vm709_vm12 = vcmp.lt.s32.totalorder %v600_v42, 0  ;;  %v710_v43 = vceil.f32 %v600_v42  ;;  %v711_v44 = vfloor.f32 %v600_v42 }
 0x40a   :  { %v576_v39 = vadd.f32 %v575_v38, %v574_v36  ;;  %v712_v45 = vsel %vm709_vm12, %v710_v43, %v711_v44 }
 0x40b   :  { %v713_v46 = vcvt.f32.s32 %v712_v45 }
 0x40c   :  { %707 = vpush %v576_v39 }
 0x40d   :  { %604 = vst.msk [vmem:[#allocation13] sm:$0x1] %vm603_vm13, %v713_v46 }
 0x40e   :  { %635 = dma.vmem_to_hbm [thread:$0]  %s631_s17, 16, %s633_s20, [#allocation14]  }
 0x43d   :  { %s708_s24 = spop %707 }
 0x43e   :  { %s609_s25 = smul.f32 0.0012207031, %s708_s24 }
 0x440   :  { %611 = sst [smem:[#allocation15]] %s609_s25 }
 0x441   :  { %644 = dma.smem_to_hbm %s877_s26, 16, %s642_s23, [#allocation8]  }
 0x442   :  { %862 = dma.done.wait [#allocation7], 512  }
 0x443   :  { %863 = vsyncadd [#allocation7], 4294966784 }
 0x444   :  { %864 = dma.done.wait [#allocation14], 16  }
 0x445   :  { %865 = vsyncadd [#allocation14], 4294967280 }
 0x446   :  { %866 = dma.done.wait [#allocation8], 16  }
 0x447   :  { %867 = vsyncadd [#allocation8], 4294967280 }
 0x448   :  { %657 = sfence }
 0x449   :  { %658 = vsyncpa [#allocation6], 1 }
 0x44a   :  { %659 = vsyncpa [#allocation10], 1 }
 0x44b   :  { %660 = vsyncpa [#allocation7], 1 }
 0x44c   :  { %661 = vsyncpa [#allocation14], 1 }
 0x44d   :  { %662 = vsyncpa [#allocation8], 1 }

</bundles_post_ra>
